<compile_context>
chip_gen: v7x
topology: tpu7x:2x2x1
jax: 0.10.0
libtpu: 0.0.40
codegen_flags: <defaults>
</compile_context>

<pallas_src>
import jax
import jax.numpy as jnp
import numpy as np
from jax.experimental import pallas as pl
from jax.experimental.pallas import tpu as pltpu


def _round_up(x, m):
    return ((x + m - 1) // m) * m


# ----------------------------------------------------------------------------
# Fused kernel (whole MLP per batch tile)
# ----------------------------------------------------------------------------
def _make_fused_mlp_kernel(num_hidden, layer_norm, eps):
    """Build a kernel: refs = (x_ref, *param_refs, o_ref).

    param_refs layout (flat):
      per hidden layer: w, b[, gamma, beta]   (gamma/beta only if layer_norm)
      then:             w_out, b_out
    """
    per_layer = 4 if layer_norm else 2

    def kernel(*refs):
        x_ref, o_ref = refs[0], refs[-1]
        p = refs[1:-1]

        h = x_ref[...].astype(jnp.float32)
        idx = 0
        for _ in range(num_hidden):
            w = p[idx][...]
            b = p[idx + 1][...]
            # TODO(synk): if hidden_dim is ever scaled to >=128-256, cast h/w
            # to bfloat16 here on v6e/v7x (keep preferred_element_type=f32 and
            # the LN/ELU math in f32); at 16/32-wide shapes the MXU is idle and
            # the kernel is HBM-bound, so it is not a win today.
            y = jnp.dot(h, w, preferred_element_type=jnp.float32) + b
            if layer_norm:
                g = p[idx + 2][...]
                beta = p[idx + 3][...]
                mean = jnp.mean(y, axis=-1, keepdims=True)
                yc = y - mean
                var = jnp.mean(yc * yc, axis=-1, keepdims=True)
                y = yc * jax.lax.rsqrt(var + eps)
                y = y * g + beta
            # ELU (alpha=1); clamp the exp argument so the unselected branch is
            # cheap and never overflows the EUP.
            neg = jnp.exp(jnp.minimum(y, 0.0)) - 1.0
            h = jnp.where(y > 0.0, y, neg)
            idx += per_layer

        w_out = p[idx][...]
        b_out = p[idx + 1][...]
        out = jnp.dot(h, w_out, preferred_element_type=jnp.float32) + b_out
        o_ref[...] = out.astype(o_ref.dtype)

    return kernel


# ----------------------------------------------------------------------------
# Parameters (shapes match the torch module; weights stored (fan_in, fan_out))
# ----------------------------------------------------------------------------
def init_mlp_params(key, in_dim, out_dim, hidden_dim, hidden_layers, layer_norm):
    params = {"hidden": [], "layer_norm": layer_norm, "out_dim": out_dim}
    dims_in = [in_dim] + [hidden_dim] * (hidden_layers - 1)
    for i in range(hidden_layers):
        key, kw, kb = jax.random.split(key, 3)
        fan_in = dims_in[i]
        bound = 1.0 / np.sqrt(fan_in)
        w = jax.random.uniform(kw, (fan_in, hidden_dim), jnp.float32, -bound, bound)
        b = jax.random.uniform(kb, (1, hidden_dim), jnp.float32, -bound, bound)
        layer = {"w": w, "b": b}
        if layer_norm:
            layer["gamma"] = jnp.ones((1, hidden_dim), jnp.float32)
            layer["beta"] = jnp.zeros((1, hidden_dim), jnp.float32)
        params["hidden"].append(layer)
    key, kw, kb = jax.random.split(key, 3)
    bound = 1.0 / np.sqrt(hidden_dim)
    params["w_out"] = jax.random.uniform(kw, (hidden_dim, out_dim), jnp.float32, -bound, bound)
    params["b_out"] = jax.random.uniform(kb, (1, out_dim), jnp.float32, -bound, bound)
    return params


# ----------------------------------------------------------------------------
# Forward pass: one pallas_call for the whole network
# ----------------------------------------------------------------------------
def mlp_forward(params, x, *, max_tile_b=4096, min_grid_steps=1, eps=0.001):
    """x: (B, in_dim) float32 -> (B, out_dim) float32 (or (B,) if out_dim == 1).

    min_grid_steps: set to 2 when targeting v7x (2 TensorCores) with a large
    batch so the "parallel" batch axis shards across both cores; leave at 1
    for single-TC v5e/v6e (splitting a small batch only doubles per-step
    overhead).
    """
    B, in_dim = x.shape
    out_dim = params["out_dim"]
    layer_norm = params["layer_norm"]
    hidden_layers = len(params["hidden"])

    # Batch tiling: big tiles (amortize the ~0.35 us per-grid-step overhead);
    # the ragged tail is handled by Pallas partial-boundary blocks (masked
    # stores), so the input is never padded/copied on the wrapper side.
    tile_b = max(8, min(max_tile_b,
                        _round_up(pl.cdiv(B, max(1, min_grid_steps)), 8)))
    grid = (pl.cdiv(B, tile_b),)

    # Flat parameter list (all resident in VMEM via constant index_maps; Pallas
    # only fetches them once since the block index never changes).
    flat_params = []
    for layer in params["hidden"]:
        flat_params += [layer["w"], layer["b"]]
        if layer_norm:
            flat_params += [layer["gamma"], layer["beta"]]
    flat_params += [params["w_out"], params["b_out"]]

    in_specs = [pl.BlockSpec((tile_b, in_dim), lambda i: (i, 0))]
    for prm in flat_params:
        nd = prm.ndim
        in_specs.append(pl.BlockSpec(prm.shape, lambda i, _nd=nd: (0,) * _nd))

    kernel = _make_fused_mlp_kernel(hidden_layers, layer_norm, eps)

    y = pl.pallas_call(
        kernel,
        # Exact (B, out_dim) output: no lane padding, no wrapper slice pass.
        out_shape=jax.ShapeDtypeStruct((B, out_dim), jnp.float32),
        grid_spec=pltpu.PrefetchScalarGridSpec(
            num_scalar_prefetch=0,
            grid=grid,
            in_specs=in_specs,
            # Block last dim == full array last dim (legal below 128 lanes);
            # masked partial stores are negligible at out_dim of 1-4 compared
            # to the 32-128x write amplification the 128-lane pad caused.
            out_specs=pl.BlockSpec((tile_b, out_dim), lambda i: (i, 0)),
        ),
        compiler_params=pltpu.CompilerParams(
            dimension_semantics=("parallel",),
            # Footprint is < ~2 MiB even at tile_b=4096; 32 MiB is safe on
            # every generation (v7x scoped default is 32 of 64 MiB).
            vmem_limit_bytes=32 * 1024 * 1024,
        ),
    )(x, *flat_params)

    if out_dim == 1:
        y = y.reshape(-1)  # nn.Flatten(0): (B, 1) -> (B,)
    return y


# ----------------------------------------------------------------------------
# Pure-JAX reference (mirrors the torch forward semantics)
# ----------------------------------------------------------------------------
def mlp_reference(params, x, eps=0.001):
    h = x
    for layer in params["hidden"]:
        y = h @ layer["w"] + layer["b"]
        if params["layer_norm"]:
            mean = jnp.mean(y, axis=-1, keepdims=True)
            var = jnp.mean((y - mean) ** 2, axis=-1, keepdims=True)
            y = (y - mean) / jnp.sqrt(var + eps)
            y = y * layer["gamma"] + layer["beta"]
        h = jnp.where(y > 0.0, y, jnp.exp(jnp.minimum(y, 0.0)) - 1.0)  # ELU
    y = h @ params["w_out"] + params["b_out"]
    if params["out_dim"] == 1:
        y = y.reshape(-1)
    return y


# ----------------------------------------------------------------------------
if __name__ == "__main__":
    key = jax.random.PRNGKey(0)

    # MLP(in_dim, out_dim, hidden_dim, hidden_layers, layer_norm)
    B, IN_DIM, HIDDEN_DIM, HIDDEN_LAYERS = 16, 16, 32, 2

    kx, kp1, kp2, kx2 = jax.random.split(key, 4)
    x = jax.random.normal(kx, (B, IN_DIM), jnp.float32)

    # Case 1: out_dim > 1, layer_norm=True
    params_a = init_mlp_params(kp1, IN_DIM, 4, HIDDEN_DIM, HIDDEN_LAYERS, layer_norm=True)
    y_a = jax.block_until_ready(mlp_forward(params_a, x))
    ref_a = mlp_reference(params_a, x)
    np.testing.assert_allclose(np.asarray(y_a), np.asarray(ref_a), rtol=1e-4, atol=1e-4)
    assert y_a.shape == (B, 4)

    # Case 2: out_dim == 1 (exercises Flatten(0)), layer_norm=False (NoNorm path)
    params_b = init_mlp_params(kp2, IN_DIM, 1, HIDDEN_DIM, HIDDEN_LAYERS, layer_norm=False)
    y_b = jax.block_until_ready(mlp_forward(params_b, x))
    ref_b = mlp_reference(params_b, x)
    np.testing.assert_allclose(np.asarray(y_b), np.asarray(ref_b), rtol=1e-4, atol=1e-4)
    assert y_b.shape == (B,)

    # Case 3: ragged batch (partial boundary block, single grid step, no padding)
    x3 = jax.random.normal(kx, (B + 3, IN_DIM), jnp.float32)
    y_c = jax.block_until_ready(mlp_forward(params_a, x3))
    ref_c = mlp_reference(params_a, x3)
    np.testing.assert_allclose(np.asarray(y_c), np.asarray(ref_c), rtol=1e-4, atol=1e-4)
    assert y_c.shape == (B + 3, 4)

    # Case 4: multi-step grid with a ragged tail tile (exercises masked last block)
    x4 = jax.random.normal(kx2, (100, IN_DIM), jnp.float32)
    y_d = jax.block_until_ready(mlp_forward(params_a, x4, max_tile_b=32))
    ref_d = mlp_reference(params_a, x4)
    np.testing.assert_allclose(np.asarray(y_d), np.asarray(ref_d), rtol=1e-4, atol=1e-4)
    assert y_d.shape == (100, 4)

    print("KERNEL_OK")
</pallas_src>

<mosaic_0001>
module attributes {stable_mosaic.version = 11 : i64} {
  func.func @kernel(%arg0: i32, %arg1: memref<16x16xf32, #tpu.memory_space<vmem>>, %arg2: memref<16x32xf32, #tpu.memory_space<vmem>>, %arg3: memref<1x32xf32, #tpu.memory_space<vmem>>, %arg4: memref<1x32xf32, #tpu.memory_space<vmem>>, %arg5: memref<1x32xf32, #tpu.memory_space<vmem>>, %arg6: memref<32x32xf32, #tpu.memory_space<vmem>>, %arg7: memref<1x32xf32, #tpu.memory_space<vmem>>, %arg8: memref<1x32xf32, #tpu.memory_space<vmem>>, %arg9: memref<1x32xf32, #tpu.memory_space<vmem>>, %arg10: memref<32x4xf32, #tpu.memory_space<vmem>>, %arg11: memref<1x4xf32, #tpu.memory_space<vmem>>, %arg12: memref<16x4xf32, #tpu.memory_space<vmem>>) attributes {dimension_semantics = [#tpu.dimension_semantics<parallel>], iteration_bounds = array<i64: 1>, scalar_prefetch = 0 : i64, scratch_operands = 0 : i64, tpu.core_type = #tpu.core_type<tc>, window_params = [{transform_indices = @transform_0, window_bounds = array<i64: 16, 16>}, {pipeline_mode = #tpu.pipeline_mode<synchronous>, transform_indices = @transform_1, window_bounds = array<i64: 16, 32>}, {pipeline_mode = #tpu.pipeline_mode<synchronous>, transform_indices = @transform_2, window_bounds = array<i64: 1, 32>}, {pipeline_mode = #tpu.pipeline_mode<synchronous>, transform_indices = @transform_3, window_bounds = array<i64: 1, 32>}, {pipeline_mode = #tpu.pipeline_mode<synchronous>, transform_indices = @transform_4, window_bounds = array<i64: 1, 32>}, {pipeline_mode = #tpu.pipeline_mode<synchronous>, transform_indices = @transform_5, window_bounds = array<i64: 32, 32>}, {pipeline_mode = #tpu.pipeline_mode<synchronous>, transform_indices = @transform_6, window_bounds = array<i64: 1, 32>}, {pipeline_mode = #tpu.pipeline_mode<synchronous>, transform_indices = @transform_7, window_bounds = array<i64: 1, 32>}, {pipeline_mode = #tpu.pipeline_mode<synchronous>, transform_indices = @transform_8, window_bounds = array<i64: 1, 32>}, {pipeline_mode = #tpu.pipeline_mode<synchronous>, transform_indices = @transform_9, window_bounds = array<i64: 32, 4>}, {pipeline_mode = #tpu.pipeline_mode<synchronous>, transform_indices = @transform_10, window_bounds = array<i64: 1, 4>}, {transform_indices = @transform_11, window_bounds = array<i64: 16, 4>}]} {
    %c0 = arith.constant 0 : index
    %c0_0 = arith.constant 0 : index
    %0 = vector.load %arg1[%c0, %c0_0] : memref<16x16xf32, #tpu.memory_space<vmem>>, vector<16x16xf32>
    %c0_1 = arith.constant 0 : index
    %c0_2 = arith.constant 0 : index
    %1 = vector.load %arg2[%c0_1, %c0_2] : memref<16x32xf32, #tpu.memory_space<vmem>>, vector<16x32xf32>
    %c0_3 = arith.constant 0 : index
    %c0_4 = arith.constant 0 : index
    %2 = vector.load %arg3[%c0_3, %c0_4] : memref<1x32xf32, #tpu.memory_space<vmem>>, vector<1x32xf32>
    %cst = arith.constant dense<0.000000e+00> : vector<16x32xf32>
    %3 = tpu.matmul %0, %1, %cst {dimension_numbers = #tpu.dot_dimension_numbers<[1], [0], [0], [1], [0, 0, 1, 1], [], []>} : vector<16x16xf32>, vector<16x32xf32>, vector<16x32xf32> -> vector<16x32xf32>
    %4 = vector.broadcast %2 : vector<1x32xf32> to vector<16x32xf32>
    %5 = arith.addf %3, %4 : vector<16x32xf32>
    %c0_5 = arith.constant 0 : index
    %c0_6 = arith.constant 0 : index
    %6 = vector.load %arg4[%c0_5, %c0_6] : memref<1x32xf32, #tpu.memory_space<vmem>>, vector<1x32xf32>
    %c0_7 = arith.constant 0 : index
    %c0_8 = arith.constant 0 : index
    %7 = vector.load %arg5[%c0_7, %c0_8] : memref<1x32xf32, #tpu.memory_space<vmem>>, vector<1x32xf32>
    %cst_9 = arith.constant dense<0.000000e+00> : vector<16xf32>
    %8 = vector.multi_reduction <add>, %5, %cst_9 [1] : vector<16x32xf32> to vector<16xf32>
    %9 = vector.shape_cast %8 : vector<16xf32> to vector<16x1xf32>
    %cst_10 = arith.constant 3.200000e+01 : f32
    %10 = vector.broadcast %cst_10 : f32 to vector<16x1xf32>
    %11 = arith.divf %9, %10 : vector<16x1xf32>
    %12 = vector.broadcast %11 : vector<16x1xf32> to vector<16x32xf32>
    %13 = arith.subf %5, %12 : vector<16x32xf32>
    %14 = arith.mulf %13, %13 : vector<16x32xf32>
    %cst_11 = arith.constant dense<0.000000e+00> : vector<16xf32>
    %15 = vector.multi_reduction <add>, %14, %cst_11 [1] : vector<16x32xf32> to vector<16xf32>
    %16 = vector.shape_cast %15 : vector<16xf32> to vector<16x1xf32>
    %cst_12 = arith.constant 3.200000e+01 : f32
    %17 = vector.broadcast %cst_12 : f32 to vector<16x1xf32>
    %18 = arith.divf %16, %17 : vector<16x1xf32>
    %cst_13 = arith.constant 1.000000e-03 : f32
    %19 = vector.broadcast %cst_13 : f32 to vector<16x1xf32>
    %20 = arith.addf %18, %19 : vector<16x1xf32>
    %21 = math.rsqrt %20 : vector<16x1xf32>
    %22 = vector.broadcast %21 : vector<16x1xf32> to vector<16x32xf32>
    %23 = arith.mulf %13, %22 : vector<16x32xf32>
    %24 = vector.broadcast %6 : vector<1x32xf32> to vector<16x32xf32>
    %25 = arith.mulf %23, %24 : vector<16x32xf32>
    %26 = vector.broadcast %7 : vector<1x32xf32> to vector<16x32xf32>
    %27 = arith.addf %25, %26 : vector<16x32xf32>
    %cst_14 = arith.constant 0.000000e+00 : f32
    %28 = vector.broadcast %cst_14 : f32 to vector<16x32xf32>
    %29 = arith.minimumf %27, %28 : vector<16x32xf32>
    %30 = math.exp %29 : vector<16x32xf32>
    %cst_15 = arith.constant 1.000000e+00 : f32
    %31 = vector.broadcast %cst_15 : f32 to vector<16x32xf32>
    %32 = arith.subf %30, %31 : vector<16x32xf32>
    %cst_16 = arith.constant 0.000000e+00 : f32
    %33 = vector.broadcast %cst_16 : f32 to vector<16x32xf32>
    %34 = arith.cmpf ogt, %27, %33 : vector<16x32xf32>
    %35 = arith.select %34, %27, %32 : vector<16x32xi1>, vector<16x32xf32>
    %c0_17 = arith.constant 0 : index
    %c0_18 = arith.constant 0 : index
    %36 = vector.load %arg6[%c0_17, %c0_18] : memref<32x32xf32, #tpu.memory_space<vmem>>, vector<32x32xf32>
    %c0_19 = arith.constant 0 : index
    %c0_20 = arith.constant 0 : index
    %37 = vector.load %arg7[%c0_19, %c0_20] : memref<1x32xf32, #tpu.memory_space<vmem>>, vector<1x32xf32>
    %cst_21 = arith.constant dense<0.000000e+00> : vector<16x32xf32>
    %38 = tpu.matmul %35, %36, %cst_21 {dimension_numbers = #tpu.dot_dimension_numbers<[1], [0], [0], [1], [0, 0, 1, 1], [], []>} : vector<16x32xf32>, vector<32x32xf32>, vector<16x32xf32> -> vector<16x32xf32>
    %39 = vector.broadcast %37 : vector<1x32xf32> to vector<16x32xf32>
    %40 = arith.addf %38, %39 : vector<16x32xf32>
    %c0_22 = arith.constant 0 : index
    %c0_23 = arith.constant 0 : index
    %41 = vector.load %arg8[%c0_22, %c0_23] : memref<1x32xf32, #tpu.memory_space<vmem>>, vector<1x32xf32>
    %c0_24 = arith.constant 0 : index
    %c0_25 = arith.constant 0 : index
    %42 = vector.load %arg9[%c0_24, %c0_25] : memref<1x32xf32, #tpu.memory_space<vmem>>, vector<1x32xf32>
    %cst_26 = arith.constant dense<0.000000e+00> : vector<16xf32>
    %43 = vector.multi_reduction <add>, %40, %cst_26 [1] : vector<16x32xf32> to vector<16xf32>
    %44 = vector.shape_cast %43 : vector<16xf32> to vector<16x1xf32>
    %cst_27 = arith.constant 3.200000e+01 : f32
    %45 = vector.broadcast %cst_27 : f32 to vector<16x1xf32>
    %46 = arith.divf %44, %45 : vector<16x1xf32>
    %47 = vector.broadcast %46 : vector<16x1xf32> to vector<16x32xf32>
    %48 = arith.subf %40, %47 : vector<16x32xf32>
    %49 = arith.mulf %48, %48 : vector<16x32xf32>
    %cst_28 = arith.constant dense<0.000000e+00> : vector<16xf32>
    %50 = vector.multi_reduction <add>, %49, %cst_28 [1] : vector<16x32xf32> to vector<16xf32>
    %51 = vector.shape_cast %50 : vector<16xf32> to vector<16x1xf32>
    %cst_29 = arith.constant 3.200000e+01 : f32
    %52 = vector.broadcast %cst_29 : f32 to vector<16x1xf32>
    %53 = arith.divf %51, %52 : vector<16x1xf32>
    %cst_30 = arith.constant 1.000000e-03 : f32
    %54 = vector.broadcast %cst_30 : f32 to vector<16x1xf32>
    %55 = arith.addf %53, %54 : vector<16x1xf32>
    %56 = math.rsqrt %55 : vector<16x1xf32>
    %57 = vector.broadcast %56 : vector<16x1xf32> to vector<16x32xf32>
    %58 = arith.mulf %48, %57 : vector<16x32xf32>
    %59 = vector.broadcast %41 : vector<1x32xf32> to vector<16x32xf32>
    %60 = arith.mulf %58, %59 : vector<16x32xf32>
    %61 = vector.broadcast %42 : vector<1x32xf32> to vector<16x32xf32>
    %62 = arith.addf %60, %61 : vector<16x32xf32>
    %cst_31 = arith.constant 0.000000e+00 : f32
    %63 = vector.broadcast %cst_31 : f32 to vector<16x32xf32>
    %64 = arith.minimumf %62, %63 : vector<16x32xf32>
    %65 = math.exp %64 : vector<16x32xf32>
    %cst_32 = arith.constant 1.000000e+00 : f32
    %66 = vector.broadcast %cst_32 : f32 to vector<16x32xf32>
    %67 = arith.subf %65, %66 : vector<16x32xf32>
    %cst_33 = arith.constant 0.000000e+00 : f32
    %68 = vector.broadcast %cst_33 : f32 to vector<16x32xf32>
    %69 = arith.cmpf ogt, %62, %68 : vector<16x32xf32>
    %70 = arith.select %69, %62, %67 : vector<16x32xi1>, vector<16x32xf32>
    %c0_34 = arith.constant 0 : index
    %c0_35 = arith.constant 0 : index
    %71 = vector.load %arg10[%c0_34, %c0_35] : memref<32x4xf32, #tpu.memory_space<vmem>>, vector<32x4xf32>
    %c0_36 = arith.constant 0 : index
    %c0_37 = arith.constant 0 : index
    %72 = vector.load %arg11[%c0_36, %c0_37] : memref<1x4xf32, #tpu.memory_space<vmem>>, vector<1x4xf32>
    %cst_38 = arith.constant dense<0.000000e+00> : vector<16x4xf32>
    %73 = tpu.matmul %70, %71, %cst_38 {dimension_numbers = #tpu.dot_dimension_numbers<[1], [0], [0], [1], [0, 0, 1, 1], [], []>} : vector<16x32xf32>, vector<32x4xf32>, vector<16x4xf32> -> vector<16x4xf32>
    %74 = vector.broadcast %72 : vector<1x4xf32> to vector<16x4xf32>
    %75 = arith.addf %73, %74 : vector<16x4xf32>
    %c0_39 = arith.constant 0 : index
    %c0_40 = arith.constant 0 : index
    %76 = vector.load %arg12[%c0_39, %c0_40] : memref<16x4xf32, #tpu.memory_space<vmem>>, vector<16x4xf32>
    tpu.vector_store %arg12[%c0_39, %c0_40], %75 {strides = array<i32>} : memref<16x4xf32, #tpu.memory_space<vmem>>, vector<16x4xf32>,
    return
  }
  func.func @transform_0(%arg0: i32) -> (i32, i32) {
    %c0_i32 = arith.constant 0 : i32
    %c0_i32_0 = arith.constant 0 : i32
    return %arg0, %c0_i32 : i32, i32
  }
  func.func @transform_1(%arg0: i32) -> (i32, i32) {
    %c0_i32 = arith.constant 0 : i32
    %c0_i32_0 = arith.constant 0 : i32
    %c0_i32_1 = arith.constant 0 : i32
    return %c0_i32, %c0_i32_0 : i32, i32
  }
  func.func @transform_2(%arg0: i32) -> (i32, i32) {
    %c0_i32 = arith.constant 0 : i32
    %c0_i32_0 = arith.constant 0 : i32
    %c0_i32_1 = arith.constant 0 : i32
    return %c0_i32, %c0_i32_0 : i32, i32
  }
  func.func @transform_3(%arg0: i32) -> (i32, i32) {
    %c0_i32 = arith.constant 0 : i32
    %c0_i32_0 = arith.constant 0 : i32
    %c0_i32_1 = arith.constant 0 : i32
    return %c0_i32, %c0_i32_0 : i32, i32
  }
  func.func @transform_4(%arg0: i32) -> (i32, i32) {
    %c0_i32 = arith.constant 0 : i32
    %c0_i32_0 = arith.constant 0 : i32
    %c0_i32_1 = arith.constant 0 : i32
    return %c0_i32, %c0_i32_0 : i32, i32
  }
  func.func @transform_5(%arg0: i32) -> (i32, i32) {
    %c0_i32 = arith.constant 0 : i32
    %c0_i32_0 = arith.constant 0 : i32
    %c0_i32_1 = arith.constant 0 : i32
    return %c0_i32, %c0_i32_0 : i32, i32
  }
  func.func @transform_6(%arg0: i32) -> (i32, i32) {
    %c0_i32 = arith.constant 0 : i32
    %c0_i32_0 = arith.constant 0 : i32
    %c0_i32_1 = arith.constant 0 : i32
    return %c0_i32, %c0_i32_0 : i32, i32
  }
  func.func @transform_7(%arg0: i32) -> (i32, i32) {
    %c0_i32 = arith.constant 0 : i32
    %c0_i32_0 = arith.constant 0 : i32
    %c0_i32_1 = arith.constant 0 : i32
    return %c0_i32, %c0_i32_0 : i32, i32
  }
  func.func @transform_8(%arg0: i32) -> (i32, i32) {
    %c0_i32 = arith.constant 0 : i32
    %c0_i32_0 = arith.constant 0 : i32
    %c0_i32_1 = arith.constant 0 : i32
    return %c0_i32, %c0_i32_0 : i32, i32
  }
  func.func @transform_9(%arg0: i32) -> (i32, i32) {
    %c0_i32 = arith.constant 0 : i32
    %c0_i32_0 = arith.constant 0 : i32
    %c0_i32_1 = arith.constant 0 : i32
    return %c0_i32, %c0_i32_0 : i32, i32
  }
  func.func @transform_10(%arg0: i32) -> (i32, i32) {
    %c0_i32 = arith.constant 0 : i32
    %c0_i32_0 = arith.constant 0 : i32
    %c0_i32_1 = arith.constant 0 : i32
    return %c0_i32, %c0_i32_0 : i32, i32
  }
  func.func @transform_11(%arg0: i32) -> (i32, i32) {
    %c0_i32 = arith.constant 0 : i32
    %c0_i32_0 = arith.constant 0 : i32
    return %arg0, %c0_i32 : i32, i32
  }
}

</mosaic_0001>

<bundles_post_ra>
// kernel: tpu_custom_call.1
= control target key start
LH: loop header
LB: loop body
LE: loop exit
PB: predicated region body
PF: predicated region fallthrough
CT: control target
= control target key end

     0   :  { %16 = vsyncpa [#allocation3], 0  ;;  %s576_s17 = smov [#allocation2]   ;;  %s720_s0 = inlined_call_operand.vmem [shape: f32[16,16], index: 0, kind: input, shape index: {}]   ;;  %s721_s1 = inlined_call_operand.hbm [shape: f32[16,32], index: 1, kind: input, shape index: {}]   ;;  %s722_s2 = inlined_call_operand.vmem [shape: f32[1,32], index: 2, kind: input, shape index: {}]   ;;  %s723_s3 = inlined_call_operand.vmem [shape: f32[1,32], index: 3, kind: input, shape index: {}]   ;;  %s724_s4 = inlined_call_operand.vmem [shape: f32[1,32], index: 4, kind: input, shape index: {}]   ;;  %s725_s5 = inlined_call_operand.vmem [shape: f32[32,32], index: 5, kind: input, shape index: {}]   ;;  %s726_s6 = inlined_call_operand.vmem [shape: f32[1,32], index: 6, kind: input, shape index: {}]   ;;  %s727_s7 = inlined_call_operand.vmem [shape: f32[1,32], index: 7, kind: input, shape index: {}]   ;;  %s728_s8 = inlined_call_operand.vmem [shape: f32[1,32], index: 8, kind: input, shape index: {}]   ;;  %s729_s9 = inlined_call_operand.vmem [shape: f32[32,4], index: 9, kind: input, shape index: {}]   ;;  %s730_s10 = inlined_call_operand.vmem [shape: f32[1,4], index: 10, kind: input, shape index: {}]   ;;  %s731_s11 = inlined_call_operand.vmem [shape: f32[16,4], index: 11, kind: output, shape index: {}]  }
   0x1   :  { %s24_s18 = sshll.u32 %s576_s17, 4  ;;  %s552_s21 = scalar_lea.hbm %s721_s1, 256  ;;  %s25_s18 = int_to_ptr.vmem [resolvable:$true] %s24_s18 }
   0x2   :  { %p553_p0 = scmp.ne.s32.totalorder %s721_s1, %s552_s21  ;;  %p556_p1 = scmp.lt.u32.totalorder %s552_s21, %s721_s1 }
   0x4   :  { %p558_p2 = pnand %p556_p1, %p553_p0 }
   0x6   :  { %561 = shalt.err (!%p558_p2)
}
   0x7   :  { %s562_s26 = scalar_lea.vmem %s25_s18, 256  ;;  %p567_p4 = scmp.lt.s32.totalorder %s25_s18, %s25_s18 }
   0x8   :  { %p563_p3 = scmp.ne.s32.totalorder %s25_s18, %s562_s26  ;;  %p568_p5 = scmp.lt.s32.totalorder %s562_s26, %s562_s26 }
   0xa   :  { %p569_p6 = por %p568_p5, %p567_p4 }
   0xc   :  { %p570_p7 = pnand %p569_p6, %p563_p3 }
   0xe   :  { %573 = shalt.err (!%p570_p7)
}
   0xf   :  { %s577_s27 = smov 128   ;;  %s578_s28 = smov 8  }
  0x10   :  { %30 = dma.hbm_to_vmem [thread:$0]  %s721_s1, 256, %s25_s18, [#allocation3], %s577_s27, %s577_s27, %s578_s28  }
  0x11   :  { %574 = dma.done.wait [#allocation3], 256  }
  0x12   :  { %575 = vsyncadd [#allocation3], 4294967040  ;;  %vm63_vm0 = vcmask 130048   ;;  %v54_v0 = vld [vmem:[#allocation2] sm:$0xff]  ;;  %v55_v1 = vld [vmem:[#allocation2 + $0x8] sm:$0xff]  ;;  %vm147_vm1 = vcmask 261120  }
  0x13   :  { %v52_v2 = vld [vmem:[%s720_s0] sm:$0xff]  ;;  %v513_v3 = vpack.c.bf16 %v55_v1, %v54_v0  ;;  %v53_v4 = vld [vmem:[%s720_s0 + $0x8] sm:$0xff]  ;;  %v205_v24 = vld [vmem:[%s725_s5 + $0x10] sm:$0xff]  ;;  %vm443_vm6 = vcmask 31744  }
  0x14   :  { %488 = vmatprep.mubr.msk.f32.mxu0 %vm63_vm0, %v52_v2  ;;  %v451_v5 = vld [vmem:[%s722_s2] ss:$0 sm:$0xff]  ;;  %v204_v23 = vld [vmem:[%s725_s5 + $0x8] sm:$0xff]  ;;  %v206_v26 = vld [vmem:[%s725_s5 + $0x18] sm:$0xff] }
  0x15   :  { %514 = vmatprep.subr.bf16.mxu0 %v513_v3  ;;  %v203_v22 = vld [vmem:[%s725_s5] sm:$0xff]  ;;  %v521_v27 = vpack.c.bf16 %v206_v26, %v205_v24 }
  0x16   :  { %516 = vmatpush3.bf16.msra.mxu0 %v513_v3  ;;  %v517_v25 = vpack.c.bf16 %v204_v23, %v203_v22  ;;  %v454_v35 = vld [vmem:[%s723_s3] ss:$0 sm:$0xff] }
  0x17   :  { %v455_v37 = vld [vmem:[%s724_s4] ss:$0 sm:$0xff] }
  0x18   :  { %518 = vmatprep.subr.bf16.mxu1 %v517_v25  ;;  %v458_v54 = vld [vmem:[%s726_s6] ss:$0 sm:$0xff] }
  0x19   :  { %489 = vmatmul.mubr.msk.f32.vlgmr.msra.gmra.mrb[0].mxu0 %vm63_vm0, %v53_v4  ;;  %520 = vmatpush3.bf16.msra.mxu1 %v517_v25  ;;  %v462_v24 = vld [vmem:[%s728_s8] ss:$0 sm:$0xff] }
  0x1a   :  { %522 = vmatprep.subr.bf16.mxu1 %v521_v27 }
  0x1d   :  { %524 = vmatpush3.bf16.msra.mxu1 %v521_v27 }
  0xec   :  { %v490_v6 = vpop.f32.mrb[0].mxu0 }
  0xed   :  { %v136_v7 = vpop.f32.mrb[1].mxu0  ;;  %v142_v9 = vadd.f32 %v490_v6, %v451_v5 }
  0xee   :  { %v137_v8 = vadd.f32 %v451_v5, %v136_v7  ;;  %v351_v7 = vld [vmem:[%s729_s9] sm:$0xff] }
  0xef   :  { %v151_v11 = vsel %vm147_vm1, %v142_v9, 0.0 }
  0xf0   :  { %v148_v10 = vsel %vm147_vm1, %v137_v8, 0.0 }
  0xf1   :  { %149 = vadd.xlane.f32.xlu0 %v148_v10 }
  0xf5   :  { %152 = vadd.xlane.f32.xlu0 %v151_v11  ;;  %v354_v11 = vld [vmem:[%s729_s9 + $0x18] sm:$0xff] }
 0x17e   :  { %v150_v12 = vpop.xlane.xlu0 %149 }
 0x17f   :  { %v155_v13 = vmul.f32 0.03125, %v150_v12 }
 0x181   :  { %v157_v14 = vsub.f32 %v137_v8, %v155_v13  ;;  %v352_v8 = vld [vmem:[%s729_s9 + $0x8] sm:$0xff] }
 0x182   :  { %v153_v15 = vpop.xlane.xlu0 %152  ;;  %v525_v10 = vpack.c.bf16 %v352_v8, %v351_v7 }
 0x183   :  { %v156_v16 = vmul.f32 0.03125, %v153_v15  ;;  %v159_v17 = vmul.f32 %v157_v14, %v157_v14 }
 0x184   :  { %526 = vmatprep.subr.bf16.mxu0 %v525_v10 }
 0x185   :  { %v158_v18 = vsub.f32 %v142_v9, %v156_v16  ;;  %v161_v19 = vsel %vm147_vm1, %v159_v17, 0.0  ;;  %v353_v9 = vld [vmem:[%s729_s9 + $0x10] sm:$0xff]  ;;  %528 = vmatpush3.bf16.msra.mxu0 %v525_v10 }
 0x186   :  { %162 = vadd.xlane.f32.xlu1 %v161_v19  ;;  %v529_v12 = vpack.c.bf16 %v354_v11, %v353_v9 }
 0x187   :  { %v160_v20 = vmul.f32 %v158_v18, %v158_v18 }
 0x188   :  { %530 = vmatprep.subr.bf16.mxu0 %v529_v12 }
 0x189   :  { %v164_v21 = vsel %vm147_vm1, %v160_v20, 0.0  ;;  %532 = vmatpush3.bf16.msra.mxu0 %v529_v12  ;;  %v461_v20 = vld [vmem:[%s727_s7] ss:$0 sm:$0xff] }
 0x18a   :  { %165 = vadd.xlane.f32.xlu1 %v164_v21 }
 0x213   :  { %v163_v28 = vpop.xlane.xlu1 %162 }
 0x214   :  { %v167_v29 = vmul.f32 0.03125, %v163_v28 }
 0x216   :  { %v169_v30 = vadd.f32 0.001, %v167_v29 }
 0x217   :  { %v166_v31 = vpop.xlane.xlu1 %165 }
 0x218   :  { %536 = vrsqrt.f32 %v169_v30  ;;  %v168_v32 = vmul.f32 0.03125, %v166_v31 }
 0x21a   :  { %v170_v33 = vadd.f32 0.001, %v168_v32 }
 0x21c   :  { %538 = vrsqrt.f32 %v170_v33 }
 0x222   :  { %v537_v34 = vpop.eup %536 }
 0x223   :  { %v173_v36 = vmul.f32 %v537_v34, %v157_v14 }
 0x225   :  { %v181_v38 = vmul.f32 %v454_v35, %v173_v36 }
 0x226   :  { %v539_v39 = vpop.eup %538 }
 0x227   :  { %v174_v40 = vmul.f32 %v539_v39, %v158_v18  ;;  %v189_v41 = vadd.f32 %v455_v37, %v181_v38  ;;  %v465_v39 = vld [vmem:[%s730_s10] ss:$0 sm:$0xff] }
 0x229   :  { %v182_v42 = vmul.f32 %v454_v35, %v174_v40  ;;  %v191_v43 = vmin.f32 %v189_v41, 0.0  ;;  %vm199_vm2 = vcmp.gt.f32.partialorder %v189_v41, 0.0 }
 0x22b   :  { %v190_v44 = vadd.f32 %v455_v37, %v182_v42  ;;  %v193_v45 = vmul.f32 1.442695, %v191_v43 }
 0x22d   :  { %v192_v46 = vmin.f32 %v190_v44, 0.0  ;;  %540 = vpow2.f32 %v193_v45  ;;  %vm200_vm3 = vcmp.gt.f32.partialorder %v190_v44, 0.0 }
 0x22f   :  { %v195_v47 = vmul.f32 1.442695, %v192_v46 }
 0x231   :  { %542 = vpow2.f32 %v195_v47 }
 0x237   :  { %v541_v48 = vpop.eup %540 }
 0x238   :  { %v456_v49 = vadd.f32 -1.0, %v541_v48 }
 0x23a   :  { %v201_v50 = vsel %vm199_vm2, %v189_v41, %v456_v49 }
 0x23b   :  { %v543_v51 = vpop.eup %542  ;;  %499 = vmatprep.mubr.msk.f32.mxu1 %vm147_vm1, %v201_v50 }
 0x23c   :  { %v457_v52 = vadd.f32 -1.0, %v543_v51 }
 0x23e   :  { %v202_v53 = vsel %vm200_vm3, %v190_v44, %v457_v52 }
 0x23f   :  { %500 = vmatmul.mubr.msk.f32.vlgmr.msra.gmra.mrb[0].mxu1 %vm147_vm1, %v202_v53 }
 0x312   :  { %v501_v55 = vpop.f32.mrb[0].mxu1 }
 0x313   :  { %v292_v56 = vadd.f32 %v501_v55, %v458_v54  ;;  %v286_v57 = vpop.f32.mrb[1].mxu1 }
 0x314   :  { %v287_v58 = vadd.f32 %v458_v54, %v286_v57 }
 0x315   :  { %v300_v59 = vsel %vm147_vm1, %v292_v56, 0.0 }
 0x316   :  { %301 = vadd.xlane.f32.xlu1 %v300_v59  ;;  %v297_v60 = vsel %vm147_vm1, %v287_v58, 0.0 }
 0x317   :  { %298 = vadd.xlane.f32.xlu0 %v297_v60 }
 0x3a3   :  { %v302_v61 = vpop.xlane.xlu1 %301 }
 0x3a4   :  { %v304_v62 = vmul.f32 0.03125, %v302_v61  ;;  %v299_v63 = vpop.xlane.xlu0 %298 }
 0x3a5   :  { %v303_v0 = vmul.f32 0.03125, %v299_v63 }
 0x3a6   :  { %v306_v1 = vsub.f32 %v292_v56, %v304_v62 }
 0x3a7   :  { %v305_v2 = vsub.f32 %v287_v58, %v303_v0 }
 0x3a8   :  { %v308_v3 = vmul.f32 %v306_v1, %v306_v1 }
 0x3a9   :  { %v307_v4 = vmul.f32 %v305_v2, %v305_v2 }
 0x3aa   :  { %v312_v5 = vsel %vm147_vm1, %v308_v3, 0.0 }
 0x3ab   :  { %313 = vadd.xlane.f32.xlu1 %v312_v5  ;;  %v309_v6 = vsel %vm147_vm1, %v307_v4, 0.0 }
 0x3ac   :  { %310 = vadd.xlane.f32.xlu0 %v309_v6 }
 0x438   :  { %v314_v13 = vpop.xlane.xlu1 %313 }
 0x439   :  { %v316_v14 = vmul.f32 0.03125, %v314_v13  ;;  %v311_v15 = vpop.xlane.xlu0 %310 }
 0x43a   :  { %v315_v16 = vmul.f32 0.03125, %v311_v15 }
 0x43b   :  { %v318_v17 = vadd.f32 0.001, %v316_v14 }
 0x43c   :  { %v317_v18 = vadd.f32 0.001, %v315_v16 }
 0x43d   :  { %544 = vrsqrt.f32 %v318_v17 }
 0x43e   :  { %546 = vrsqrt.f32 %v317_v18 }
 0x447   :  { %v545_v19 = vpop.eup %544 }
 0x448   :  { %v547_v21 = vpop.eup %546  ;;  %v322_v22 = vmul.f32 %v545_v19, %v306_v1 }
 0x449   :  { %v321_v23 = vmul.f32 %v547_v21, %v305_v2 }
 0x44a   :  { %v330_v25 = vmul.f32 %v461_v20, %v322_v22 }
 0x44b   :  { %v329_v26 = vmul.f32 %v461_v20, %v321_v23 }
 0x44c   :  { %v338_v27 = vadd.f32 %v462_v24, %v330_v25 }
 0x44d   :  { %v337_v28 = vadd.f32 %v462_v24, %v329_v26 }
 0x44e   :  { %v340_v29 = vmin.f32 %v338_v27, 0.0  ;;  %vm348_vm5 = vcmp.gt.f32.partialorder %v338_v27, 0.0 }
 0x44f   :  { %v339_v30 = vmin.f32 %v337_v28, 0.0  ;;  %vm347_vm4 = vcmp.gt.f32.partialorder %v337_v28, 0.0 }
 0x450   :  { %v343_v31 = vmul.f32 1.442695, %v340_v29 }
 0x451   :  { %v341_v32 = vmul.f32 1.442695, %v339_v30 }
 0x452   :  { %548 = vpow2.f32 %v343_v31 }
 0x453   :  { %550 = vpow2.f32 %v341_v32 }
 0x45c   :  { %v549_v33 = vpop.eup %548 }
 0x45d   :  { %v551_v34 = vpop.eup %550  ;;  %v464_v35 = vadd.f32 -1.0, %v549_v33 }
 0x45e   :  { %v463_v36 = vadd.f32 -1.0, %v551_v34 }
 0x45f   :  { %v350_v38 = vsel %vm348_vm5, %v338_v27, %v464_v35 }
 0x460   :  { %v349_v37 = vsel %vm347_vm4, %v337_v28, %v463_v36 }
 0x461   :  { %510 = vmatprep.mubr.msk.f32.mxu0 %vm147_vm1, %v349_v37 }
 0x462   :  { %511 = vmatmul.mubr.msk.f32.vlgmr.msra.gmra.mrb[2].mxu0 %vm147_vm1, %v350_v38 }
 0x535   :  { %v512_v40 = vpop.f32.mrb[2].mxu0 }
 0x536   :  { %v440_v41 = vadd.f32 %v512_v40, %v465_v39  ;;  %v434_v42 = vpop.f32.mrb[3].mxu0 }
 0x537   :  { %v435_v43 = vadd.f32 %v465_v39, %v434_v42 }
 0x538   :  { %445 = vst.msk [vmem:[%s731_s11 + $0x8] sm:$0xff] %vm443_vm6, %v440_v41 }
 0x539   :  { %444 = vst.msk [vmem:[%s731_s11] sm:$0xff] %vm443_vm6, %v435_v43 }
 0x53a   :  { %450 = vsyncpa [#allocation3], 1 }

</bundles_post_ra>
